<compile_context>
chip_gen: v5e
topology: v5e:2x2
jax: 0.10.0
libtpu: 0.0.40
codegen_flags: <defaults>
</compile_context>

<pallas_src>
import numpy as np
import jax
import jax.numpy as jnp
from jax import lax
from jax.experimental import pallas as pl
from jax.experimental.pallas import tpu as pltpu

OUT_PAD = 128  # lane-dense padded channel width for the MLP tail / output rows


# -----------------------------------------------------------------------------------
# Static pooling mask: mask[tap, pixel] = (# output positions whose 3x3/s2/p1 conv tap
# `tap` reads input pixel `pixel`) / (Ho*Wo).   pool(conv(y)) == sum_t (mask@y)_t @ w2_t.
# -----------------------------------------------------------------------------------
def _build_pool_mask(H, W):
    Ho = (H - 1) // 2 + 1
    Wo = (W - 1) // 2 + 1
    m = np.zeros((9, H * W), np.float32)
    for di in range(3):
        for dj in range(3):
            t = di * 3 + dj
            for io in range(Ho):
                r = 2 * io - 1 + di
                if r < 0 or r >= H:
                    continue
                for jo in range(Wo):
                    q = 2 * jo - 1 + dj
                    if q < 0 or q >= W:
                        continue
                    m[t, r * W + q] += 1.0
    return m / float(Ho * Wo)


def _build_block_mask(H, W, TB):
    """Block-diagonal tap mask for TB images per grid step, rows ordered tap-major:
    row (t*TB + bb) holds mask[t] in the column range of image bb."""
    m = _build_pool_mask(H, W)
    HW = H * W
    mb = np.zeros((9 * TB, TB * HW), np.float32)
    for bb in range(TB):
        mb[np.arange(9) * TB + bb, bb * HW:(bb + 1) * HW] = m
    return mb


# -----------------------------------------------------------------------------------
# Wrapper: layout plumbing + a single fused pallas_call.
# -----------------------------------------------------------------------------------
def hypanet_pallas(x_nchw, params, *, matmul_dtype=jnp.bfloat16):
    f32 = jnp.float32
    mm = matmul_dtype

    b, in_nc, H, W = x_nchw.shape
    C = params["w1"].shape[0]
    out_nc = params["w5"].shape[0]
    HW = H * W
    cin_pad = ((in_nc + 7) // 8) * 8                     # 29 -> 32

    # One parallel grid step per TensorCore on v7x, everything else folded into TB.
    num_steps = min(b, 2)
    TB = -(-b // num_steps)                              # ceil(b / num_steps)
    b_pad = num_steps * TB

    # ---- activations: NCHW -> [steps, TB*HW, cin_pad] pixel-major, matmul dtype ----
    x = jnp.transpose(x_nchw, (0, 2, 3, 1)).reshape(b, HW, in_nc)
    x = jnp.pad(x, ((0, b_pad - b), (0, 0), (0, cin_pad - in_nc)))
    x = x.reshape(num_steps, TB * HW, cin_pad).astype(mm)

    # ---- packed constants (5 inputs instead of 12 -> fewer DMA descriptors) --------
    mask = jnp.asarray(_build_block_mask(H, W, TB), dtype=mm)          # [9*TB, TB*HW]

    w1t = jnp.pad(params["w1"][:, :, 0, 0].T, ((0, cin_pad - in_nc), (0, 0)))
    w2r = jnp.transpose(params["w2"], (2, 3, 1, 0)).reshape(9 * C, C)  # tap-major [Cin,Cout]
    wsp = jnp.concatenate([w1t, w2r], axis=0).astype(mm)               # [cin_pad+9C, C]

    w3p = jnp.pad(params["w3"][:, :, 0, 0].T, ((0, 0), (0, OUT_PAD - C)))
    w4p = jnp.pad(params["w4"][:, :, 0, 0].T, ((0, OUT_PAD - C), (0, OUT_PAD - C)))
    w5p = jnp.pad(params["w5"][:, :, 0, 0].T, ((0, OUT_PAD - C), (0, OUT_PAD - out_nc)))
    wmlp = jnp.concatenate([w3p, w4p, w5p], axis=0).astype(mm)         # [C+2*128, 128]

    bias = jnp.zeros((8, OUT_PAD), f32)
    bias = bias.at[0, :C].set(params["b1"])
    bias = bias.at[1, :C].set(params["b2"])
    bias = bias.at[2, :C].set(params["b3"])
    bias = bias.at[3, :C].set(params["b4"])
    bias = bias.at[4, :out_nc].set(params["b5"])

    # ------------------------------- fused kernel -----------------------------------
    def kernel(x_ref, m_ref, wsp_ref, wmlp_ref, b_ref, o_ref):
        b1 = b_ref[0:1, :C]
        b2 = b_ref[1:2, :C]
        b3 = b_ref[2:3, :]
        b4 = b_ref[3:4, :]
        b5 = b_ref[4:5, :]

        # fution: 1x1 conv + ReLU over all TB*HW pixels of this step (bf16 MXU, f32 acc)
        y = jnp.dot(x_ref[0], wsp_ref[0:cin_pad, :],
                    preferred_element_type=f32) + b1
        y = jnp.maximum(y, 0.0)                                        # [TB*HW, C] f32

        # down_sample(3x3,s2,p1) fused with AdaptiveAvgPool2d(1):
        # one mask matmul -> 9*TB averaged tap sums, then 9 independent tap partials.
        s = jnp.dot(m_ref[...], y.astype(mm), preferred_element_type=f32)   # [9*TB, C]
        s = s.astype(mm)
        parts = [
            jnp.dot(s[t * TB:(t + 1) * TB, :],
                    wsp_ref[cin_pad + t * C: cin_pad + (t + 1) * C, :],
                    preferred_element_type=f32)
            for t in range(9)
        ]
        while len(parts) > 1:                                          # tree-sum
            nxt = [parts[i] + parts[i + 1] for i in range(0, len(parts) - 1, 2)]
            if len(parts) % 2:
                nxt.append(parts[-1])
            parts = nxt
        pooled = parts[0] + b2                                         # [TB, C] f32

        # mlp: three 1x1 convs on the pooled channel vectors (padded lanes stay 0)
        h = jnp.dot(pooled.astype(mm), wmlp_ref[0:C, :],
                    preferred_element_type=f32) + b3
        h = jnp.maximum(h, 0.0)
        h = jnp.dot(h.astype(mm), wmlp_ref[C:C + OUT_PAD, :],
                    preferred_element_type=f32) + b4
        h = jnp.maximum(h, 0.0)
        z = jnp.dot(h.astype(mm), wmlp_ref[C + OUT_PAD:C + 2 * OUT_PAD, :],
                    preferred_element_type=f32) + b5
        # numerically-stable softplus + 1e-6 (f32 EUP); padded lanes sliced in wrapper
        o = jnp.maximum(z, 0.0) + jnp.log(1.0 + jnp.exp(-jnp.abs(z))) + 1e-6
        o_ref[0] = o.astype(o_ref.dtype)                               # [TB, OUT_PAD]

    fixed = lambda i: (0, 0)
    out = pl.pallas_call(
        kernel,
        out_shape=jax.ShapeDtypeStruct((num_steps, TB, OUT_PAD), f32),
        grid=(num_steps,),
        in_specs=[
            pl.BlockSpec((1, TB * HW, cin_pad), lambda i: (i, 0, 0)),  # x (per step)
            pl.BlockSpec((9 * TB, TB * HW), fixed),                    # pooling mask
            pl.BlockSpec((cin_pad + 9 * C, C), fixed),                 # w1 + 9 w2 taps
            pl.BlockSpec((C + 2 * OUT_PAD, OUT_PAD), fixed),           # w3|w4|w5 (padded)
            pl.BlockSpec((8, OUT_PAD), fixed),                         # b1..b5 packed
        ],
        out_specs=pl.BlockSpec((1, TB, OUT_PAD), lambda i: (i, 0, 0)),
        compiler_params=pltpu.CompilerParams(dimension_semantics=("parallel",)),
    )(x, mask, wsp, wmlp, bias)

    v = out.reshape(b_pad, OUT_PAD)[:b, :out_nc]                       # [b, out_nc]
    return (v[:, 0].reshape(b, 1, 1),
            v[:, 1:2].reshape(b, 1, 1, 1),
            v[:, 2:].reshape(b, out_nc - 2, 1, 1))


# -----------------------------------------------------------------------------------
# Plain-JAX f32 reference mirroring the PyTorch module (NCHW).
# -----------------------------------------------------------------------------------
def hypanet_reference(x_nchw, params):
    dn = ("NCHW", "OIHW", "NCHW")
    y = lax.conv_general_dilated(x_nchw, params["w1"], (1, 1), "VALID",
                                 dimension_numbers=dn)
    y = jnp.maximum(y + params["b1"][None, :, None, None], 0.0)
    z = lax.conv_general_dilated(y, params["w2"], (2, 2), ((1, 1), (1, 1)),
                                 dimension_numbers=dn)
    z = z + params["b2"][None, :, None, None]
    pooled = jnp.mean(z, axis=(2, 3))                                  # [b, C]
    h = jnp.maximum(pooled @ params["w3"][:, :, 0, 0].T + params["b3"], 0.0)
    h = jnp.maximum(h @ params["w4"][:, :, 0, 0].T + params["b4"], 0.0)
    o = jax.nn.softplus(h @ params["w5"][:, :, 0, 0].T + params["b5"]) + 1e-6
    o4 = o[:, :, None, None]                                           # [b, out_nc, 1, 1]
    return (o4[:, 0, :, :], o4[:, 1:2, :, :], o4[:, 2:, :, :])


if __name__ == "__main__":
    b, in_nc, out_nc, channel = 2, 29, 3, 64
    H = W = 16
    f32 = jnp.float32

    key = jax.random.PRNGKey(0)
    ks = jax.random.split(key, 11)

    def rnd(k, shape, scale):
        return jax.random.normal(k, shape, f32) * scale

    x = rnd(ks[0], (b, in_nc, H, W), 1.0)
    params = {
        "w1": rnd(ks[1], (channel, in_nc, 1, 1), 1.0 / np.sqrt(in_nc)),
        "b1": rnd(ks[2], (channel,), 0.1),
        "w2": rnd(ks[3], (channel, channel, 3, 3), 1.0 / np.sqrt(channel * 9)),
        "b2": rnd(ks[4], (channel,), 0.1),
        "w3": rnd(ks[5], (channel, channel, 1, 1), 1.0 / np.sqrt(channel)),
        "b3": rnd(ks[6], (channel,), 0.1),
        "w4": rnd(ks[7], (channel, channel, 1, 1), 1.0 / np.sqrt(channel)),
        "b4": rnd(ks[8], (channel,), 0.1),
        "w5": rnd(ks[9], (out_nc, channel, 1, 1), 1.0 / np.sqrt(channel)),
        "b5": rnd(ks[10], (out_nc,), 0.1),
    }

    refs = hypanet_reference(x, params)

    # 1) full-f32 run: proves the fused structure (conv+pool collapse, packing, batch
    #    fold) is exact.
    fwd_f32 = jax.jit(lambda xx, pp: hypanet_pallas(xx, pp, matmul_dtype=jnp.float32))
    outs_f32 = jax.block_until_ready(fwd_f32(x, params))
    for o, r in zip(outs_f32, refs):
        np.testing.assert_allclose(np.asarray(o), np.asarray(r), rtol=1e-3, atol=1e-3)

    # 2) perf configuration: bf16 MXU operands with f32 accumulation.  Expected
    #    deviation from the pure-f32 reference is ~1% relative (bf16 operand rounding),
    #    hence the looser tolerance here.
    fwd_bf16 = jax.jit(lambda xx, pp: hypanet_pallas(xx, pp, matmul_dtype=jnp.bfloat16))
    outs_bf16 = jax.block_until_ready(fwd_bf16(x, params))
    for o, r in zip(outs_bf16, refs):
        np.testing.assert_allclose(np.asarray(o), np.asarray(r), rtol=5e-2, atol=5e-3)

    print("KERNEL_OK")
</pallas_src>

<mosaic_0001>
module attributes {stable_mosaic.version = 11 : i64} {
  func.func @kernel(%arg0: i32, %arg1: memref<1x256x32xf32, #tpu.memory_space<vmem>>, %arg2: memref<9x256xf32, #tpu.memory_space<vmem>>, %arg3: memref<608x64xf32, #tpu.memory_space<vmem>>, %arg4: memref<320x128xf32, #tpu.memory_space<vmem>>, %arg5: memref<8x128xf32, #tpu.memory_space<vmem>>, %arg6: memref<1x1x128xf32, #tpu.memory_space<vmem>>) attributes {dimension_semantics = [#tpu.dimension_semantics<parallel>], iteration_bounds = array<i64: 2>, scalar_prefetch = 0 : i64, scratch_operands = 0 : i64, tpu.core_type = #tpu.core_type<tc>, window_params = [{transform_indices = @transform_0, window_bounds = array<i64: 1, 256, 32>}, {pipeline_mode = #tpu.pipeline_mode<synchronous>, transform_indices = @transform_1, window_bounds = array<i64: 9, 256>}, {pipeline_mode = #tpu.pipeline_mode<synchronous>, transform_indices = @transform_2, window_bounds = array<i64: 608, 64>}, {pipeline_mode = #tpu.pipeline_mode<synchronous>, transform_indices = @transform_3, window_bounds = array<i64: 320, 128>}, {pipeline_mode = #tpu.pipeline_mode<synchronous>, transform_indices = @transform_4, window_bounds = array<i64: 8, 128>}, {transform_indices = @transform_5, window_bounds = array<i64: 1, 1, 128>}]} {
    %c0 = arith.constant 0 : index
    %c0_0 = arith.constant 0 : index
    %0 = vector.load %arg5[%c0, %c0_0] : memref<8x128xf32, #tpu.memory_space<vmem>>, vector<1x64xf32>
    %c1 = arith.constant 1 : index
    %c0_1 = arith.constant 0 : index
    %1 = vector.load %arg5[%c1, %c0_1] : memref<8x128xf32, #tpu.memory_space<vmem>>, vector<1x64xf32>
    %c2 = arith.constant 2 : index
    %c0_2 = arith.constant 0 : index
    %2 = vector.load %arg5[%c2, %c0_2] : memref<8x128xf32, #tpu.memory_space<vmem>>, vector<1x128xf32>
    %c3 = arith.constant 3 : index
    %c0_3 = arith.constant 0 : index
    %3 = vector.load %arg5[%c3, %c0_3] : memref<8x128xf32, #tpu.memory_space<vmem>>, vector<1x128xf32>
    %c4 = arith.constant 4 : index
    %c0_4 = arith.constant 0 : index
    %4 = vector.load %arg5[%c4, %c0_4] : memref<8x128xf32, #tpu.memory_space<vmem>>, vector<1x128xf32>
    %c0_5 = arith.constant 0 : index
    %c0_6 = arith.constant 0 : index
    %c0_7 = arith.constant 0 : index
    %5 = vector.load %arg1[%c0_5, %c0_6, %c0_7] : memref<1x256x32xf32, #tpu.memory_space<vmem>>, vector<1x256x32xf32>
    %6 = vector.shape_cast %5 : vector<1x256x32xf32> to vector<256x32xf32>
    %c0_8 = arith.constant 0 : index
    %c0_9 = arith.constant 0 : index
    %7 = vector.load %arg3[%c0_8, %c0_9] : memref<608x64xf32, #tpu.memory_space<vmem>>, vector<32x64xf32>
    %cst = arith.constant dense<0.000000e+00> : vector<256x64xf32>
    %8 = tpu.matmul %6, %7, %cst {dimension_numbers = #tpu.dot_dimension_numbers<[1], [0], [0], [1], [0, 0, 1, 1], [], []>} : vector<256x32xf32>, vector<32x64xf32>, vector<256x64xf32> -> vector<256x64xf32>
    %9 = vector.broadcast %0 : vector<1x64xf32> to vector<256x64xf32>
    %10 = arith.addf %8, %9 : vector<256x64xf32>
    %cst_10 = arith.constant 0.000000e+00 : f32
    %11 = vector.broadcast %cst_10 : f32 to vector<256x64xf32>
    %12 = arith.maximumf %10, %11 : vector<256x64xf32>
    %c0_11 = arith.constant 0 : index
    %c0_12 = arith.constant 0 : index
    %13 = vector.load %arg2[%c0_11, %c0_12] : memref<9x256xf32, #tpu.memory_space<vmem>>, vector<9x256xf32>
    %cst_13 = arith.constant dense<0.000000e+00> : vector<9x64xf32>
    %14 = tpu.matmul %13, %12, %cst_13 {dimension_numbers = #tpu.dot_dimension_numbers<[1], [0], [0], [1], [0, 0, 1, 1], [], []>} : vector<9x256xf32>, vector<256x64xf32>, vector<9x64xf32> -> vector<9x64xf32>
    %15 = vector.extract_strided_slice %14 {offsets = [0, 0], sizes = [1, 64], strides = [1, 1]} : vector<9x64xf32> to vector<1x64xf32>
    %c32 = arith.constant 32 : index
    %c0_14 = arith.constant 0 : index
    %16 = vector.load %arg3[%c32, %c0_14] : memref<608x64xf32, #tpu.memory_space<vmem>>, vector<64x64xf32>
    %cst_15 = arith.constant dense<0.000000e+00> : vector<1x64xf32>
    %17 = tpu.matmul %15, %16, %cst_15 {dimension_numbers = #tpu.dot_dimension_numbers<[1], [0], [0], [1], [0, 0, 1, 1], [], []>} : vector<1x64xf32>, vector<64x64xf32>, vector<1x64xf32> -> vector<1x64xf32>
    %18 = vector.extract_strided_slice %14 {offsets = [1, 0], sizes = [1, 64], strides = [1, 1]} : vector<9x64xf32> to vector<1x64xf32>
    %c96 = arith.constant 96 : index
    %c0_16 = arith.constant 0 : index
    %19 = vector.load %arg3[%c96, %c0_16] : memref<608x64xf32, #tpu.memory_space<vmem>>, vector<64x64xf32>
    %cst_17 = arith.constant dense<0.000000e+00> : vector<1x64xf32>
    %20 = tpu.matmul %18, %19, %cst_17 {dimension_numbers = #tpu.dot_dimension_numbers<[1], [0], [0], [1], [0, 0, 1, 1], [], []>} : vector<1x64xf32>, vector<64x64xf32>, vector<1x64xf32> -> vector<1x64xf32>
    %21 = vector.extract_strided_slice %14 {offsets = [2, 0], sizes = [1, 64], strides = [1, 1]} : vector<9x64xf32> to vector<1x64xf32>
    %c160 = arith.constant 160 : index
    %c0_18 = arith.constant 0 : index
    %22 = vector.load %arg3[%c160, %c0_18] : memref<608x64xf32, #tpu.memory_space<vmem>>, vector<64x64xf32>
    %cst_19 = arith.constant dense<0.000000e+00> : vector<1x64xf32>
    %23 = tpu.matmul %21, %22, %cst_19 {dimension_numbers = #tpu.dot_dimension_numbers<[1], [0], [0], [1], [0, 0, 1, 1], [], []>} : vector<1x64xf32>, vector<64x64xf32>, vector<1x64xf32> -> vector<1x64xf32>
    %24 = vector.extract_strided_slice %14 {offsets = [3, 0], sizes = [1, 64], strides = [1, 1]} : vector<9x64xf32> to vector<1x64xf32>
    %c224 = arith.constant 224 : index
    %c0_20 = arith.constant 0 : index
    %25 = vector.load %arg3[%c224, %c0_20] : memref<608x64xf32, #tpu.memory_space<vmem>>, vector<64x64xf32>
    %cst_21 = arith.constant dense<0.000000e+00> : vector<1x64xf32>
    %26 = tpu.matmul %24, %25, %cst_21 {dimension_numbers = #tpu.dot_dimension_numbers<[1], [0], [0], [1], [0, 0, 1, 1], [], []>} : vector<1x64xf32>, vector<64x64xf32>, vector<1x64xf32> -> vector<1x64xf32>
    %27 = vector.extract_strided_slice %14 {offsets = [4, 0], sizes = [1, 64], strides = [1, 1]} : vector<9x64xf32> to vector<1x64xf32>
    %c288 = arith.constant 288 : index
    %c0_22 = arith.constant 0 : index
    %28 = vector.load %arg3[%c288, %c0_22] : memref<608x64xf32, #tpu.memory_space<vmem>>, vector<64x64xf32>
    %cst_23 = arith.constant dense<0.000000e+00> : vector<1x64xf32>
    %29 = tpu.matmul %27, %28, %cst_23 {dimension_numbers = #tpu.dot_dimension_numbers<[1], [0], [0], [1], [0, 0, 1, 1], [], []>} : vector<1x64xf32>, vector<64x64xf32>, vector<1x64xf32> -> vector<1x64xf32>
    %30 = vector.extract_strided_slice %14 {offsets = [5, 0], sizes = [1, 64], strides = [1, 1]} : vector<9x64xf32> to vector<1x64xf32>
    %c352 = arith.constant 352 : index
    %c0_24 = arith.constant 0 : index
    %31 = vector.load %arg3[%c352, %c0_24] : memref<608x64xf32, #tpu.memory_space<vmem>>, vector<64x64xf32>
    %cst_25 = arith.constant dense<0.000000e+00> : vector<1x64xf32>
    %32 = tpu.matmul %30, %31, %cst_25 {dimension_numbers = #tpu.dot_dimension_numbers<[1], [0], [0], [1], [0, 0, 1, 1], [], []>} : vector<1x64xf32>, vector<64x64xf32>, vector<1x64xf32> -> vector<1x64xf32>
    %33 = vector.extract_strided_slice %14 {offsets = [6, 0], sizes = [1, 64], strides = [1, 1]} : vector<9x64xf32> to vector<1x64xf32>
    %c416 = arith.constant 416 : index
    %c0_26 = arith.constant 0 : index
    %34 = vector.load %arg3[%c416, %c0_26] : memref<608x64xf32, #tpu.memory_space<vmem>>, vector<64x64xf32>
    %cst_27 = arith.constant dense<0.000000e+00> : vector<1x64xf32>
    %35 = tpu.matmul %33, %34, %cst_27 {dimension_numbers = #tpu.dot_dimension_numbers<[1], [0], [0], [1], [0, 0, 1, 1], [], []>} : vector<1x64xf32>, vector<64x64xf32>, vector<1x64xf32> -> vector<1x64xf32>
    %36 = vector.extract_strided_slice %14 {offsets = [7, 0], sizes = [1, 64], strides = [1, 1]} : vector<9x64xf32> to vector<1x64xf32>
    %c480 = arith.constant 480 : index
    %c0_28 = arith.constant 0 : index
    %37 = vector.load %arg3[%c480, %c0_28] : memref<608x64xf32, #tpu.memory_space<vmem>>, vector<64x64xf32>
    %cst_29 = arith.constant dense<0.000000e+00> : vector<1x64xf32>
    %38 = tpu.matmul %36, %37, %cst_29 {dimension_numbers = #tpu.dot_dimension_numbers<[1], [0], [0], [1], [0, 0, 1, 1], [], []>} : vector<1x64xf32>, vector<64x64xf32>, vector<1x64xf32> -> vector<1x64xf32>
    %39 = vector.extract_strided_slice %14 {offsets = [8, 0], sizes = [1, 64], strides = [1, 1]} : vector<9x64xf32> to vector<1x64xf32>
    %c544 = arith.constant 544 : index
    %c0_30 = arith.constant 0 : index
    %40 = vector.load %arg3[%c544, %c0_30] : memref<608x64xf32, #tpu.memory_space<vmem>>, vector<64x64xf32>
    %cst_31 = arith.constant dense<0.000000e+00> : vector<1x64xf32>
    %41 = tpu.matmul %39, %40, %cst_31 {dimension_numbers = #tpu.dot_dimension_numbers<[1], [0], [0], [1], [0, 0, 1, 1], [], []>} : vector<1x64xf32>, vector<64x64xf32>, vector<1x64xf32> -> vector<1x64xf32>
    %42 = arith.addf %17, %20 : vector<1x64xf32>
    %43 = arith.addf %23, %26 : vector<1x64xf32>
    %44 = arith.addf %29, %32 : vector<1x64xf32>
    %45 = arith.addf %35, %38 : vector<1x64xf32>
    %46 = arith.addf %42, %43 : vector<1x64xf32>
    %47 = arith.addf %44, %45 : vector<1x64xf32>
    %48 = arith.addf %46, %47 : vector<1x64xf32>
    %49 = arith.addf %48, %41 : vector<1x64xf32>
    %50 = arith.addf %49, %1 : vector<1x64xf32>
    %c0_32 = arith.constant 0 : index
    %c0_33 = arith.constant 0 : index
    %51 = vector.load %arg4[%c0_32, %c0_33] : memref<320x128xf32, #tpu.memory_space<vmem>>, vector<64x128xf32>
    %cst_34 = arith.constant dense<0.000000e+00> : vector<1x128xf32>
    %52 = tpu.matmul %50, %51, %cst_34 {dimension_numbers = #tpu.dot_dimension_numbers<[1], [0], [0], [1], [0, 0, 1, 1], [], []>} : vector<1x64xf32>, vector<64x128xf32>, vector<1x128xf32> -> vector<1x128xf32>
    %53 = arith.addf %52, %2 : vector<1x128xf32>
    %cst_35 = arith.constant 0.000000e+00 : f32
    %54 = vector.broadcast %cst_35 : f32 to vector<1x128xf32>
    %55 = arith.maximumf %53, %54 : vector<1x128xf32>
    %c64 = arith.constant 64 : index
    %c0_36 = arith.constant 0 : index
    %56 = vector.load %arg4[%c64, %c0_36] : memref<320x128xf32, #tpu.memory_space<vmem>>, vector<128x128xf32>
    %cst_37 = arith.constant dense<0.000000e+00> : vector<1x128xf32>
    %57 = tpu.matmul %55, %56, %cst_37 {dimension_numbers = #tpu.dot_dimension_numbers<[1], [0], [0], [1], [0, 0, 1, 1], [], []>} : vector<1x128xf32>, vector<128x128xf32>, vector<1x128xf32> -> vector<1x128xf32>
    %58 = arith.addf %57, %3 : vector<1x128xf32>
    %cst_38 = arith.constant 0.000000e+00 : f32
    %59 = vector.broadcast %cst_38 : f32 to vector<1x128xf32>
    %60 = arith.maximumf %58, %59 : vector<1x128xf32>
    %c192 = arith.constant 192 : index
    %c0_39 = arith.constant 0 : index
    %61 = vector.load %arg4[%c192, %c0_39] : memref<320x128xf32, #tpu.memory_space<vmem>>, vector<128x128xf32>
    %cst_40 = arith.constant dense<0.000000e+00> : vector<1x128xf32>
    %62 = tpu.matmul %60, %61, %cst_40 {dimension_numbers = #tpu.dot_dimension_numbers<[1], [0], [0], [1], [0, 0, 1, 1], [], []>} : vector<1x128xf32>, vector<128x128xf32>, vector<1x128xf32> -> vector<1x128xf32>
    %63 = arith.addf %62, %4 : vector<1x128xf32>
    %cst_41 = arith.constant 0.000000e+00 : f32
    %64 = vector.broadcast %cst_41 : f32 to vector<1x128xf32>
    %65 = arith.maximumf %63, %64 : vector<1x128xf32>
    %66 = math.absf %63 : vector<1x128xf32>
    %cst_42 = arith.constant 0.000000e+00 : f32
    %67 = vector.broadcast %cst_42 : f32 to vector<1x128xf32>
    %68 = arith.subf %67, %66 : vector<1x128xf32>
    %69 = math.exp %68 : vector<1x128xf32>
    %cst_43 = arith.constant 1.000000e+00 : f32
    %70 = vector.broadcast %cst_43 : f32 to vector<1x128xf32>
    %71 = arith.addf %70, %69 : vector<1x128xf32>
    %72 = math.log %71 : vector<1x128xf32>
    %73 = arith.addf %65, %72 : vector<1x128xf32>
    %cst_44 = arith.constant 9.99999997E-7 : f32
    %74 = vector.broadcast %cst_44 : f32 to vector<1x128xf32>
    %75 = arith.addf %73, %74 : vector<1x128xf32>
    %c0_45 = arith.constant 0 : index
    %c0_46 = arith.constant 0 : index
    %c0_47 = arith.constant 0 : index
    %76 = vector.load %arg6[%c0_45, %c0_46, %c0_47] : memref<1x1x128xf32, #tpu.memory_space<vmem>>, vector<1x1x128xf32>
    %77 = vector.shape_cast %76 : vector<1x1x128xf32> to vector<1x128xf32>
    %78 = vector.shape_cast %75 : vector<1x128xf32> to vector<1x1x128xf32>
    tpu.vector_store %arg6[%c0_45, %c0_46, %c0_47], %78 {strides = array<i32>} : memref<1x1x128xf32, #tpu.memory_space<vmem>>, vector<1x1x128xf32>,
    return
  }
  func.func @transform_0(%arg0: i32) -> (i32, i32, i32) {
    %c0_i32 = arith.constant 0 : i32
    %c0_i32_0 = arith.constant 0 : i32
    %c0_i32_1 = arith.constant 0 : i32
    return %arg0, %c0_i32, %c0_i32_0 : i32, i32, i32
  }
  func.func @transform_1(%arg0: i32) -> (i32, i32) {
    %c0_i32 = arith.constant 0 : i32
    %c0_i32_0 = arith.constant 0 : i32
    %c0_i32_1 = arith.constant 0 : i32
    return %c0_i32, %c0_i32_0 : i32, i32
  }
  func.func @transform_2(%arg0: i32) -> (i32, i32) {
    %c0_i32 = arith.constant 0 : i32
    %c0_i32_0 = arith.constant 0 : i32
    %c0_i32_1 = arith.constant 0 : i32
    return %c0_i32, %c0_i32_0 : i32, i32
  }
  func.func @transform_3(%arg0: i32) -> (i32, i32) {
    %c0_i32 = arith.constant 0 : i32
    %c0_i32_0 = arith.constant 0 : i32
    %c0_i32_1 = arith.constant 0 : i32
    return %c0_i32, %c0_i32_0 : i32, i32
  }
  func.func @transform_4(%arg0: i32) -> (i32, i32) {
    %c0_i32 = arith.constant 0 : i32
    %c0_i32_0 = arith.constant 0 : i32
    %c0_i32_1 = arith.constant 0 : i32
    return %c0_i32, %c0_i32_0 : i32, i32
  }
  func.func @transform_5(%arg0: i32) -> (i32, i32, i32) {
    %c0_i32 = arith.constant 0 : i32
    %c0_i32_0 = arith.constant 0 : i32
    %c0_i32_1 = arith.constant 0 : i32
    return %arg0, %c0_i32, %c0_i32_0 : i32, i32, i32
  }
}

</mosaic_0001>

<bundles_post_ra>
// kernel: _lambda_.1
= control target key start
LH: loop header
LB: loop body
LE: loop exit
PB: predicated region body
PF: predicated region fallthrough
CT: control target
= control target key end

     0   :  { %s1114_s18 = smov 0   ;;  %s1657_s0 = inlined_call_operand.vmem [shape: f32[2,256,32], index: 0, kind: input, shape index: {}]   ;;  %s1658_s1 = inlined_call_operand.vmem [shape: f32[9,256], index: 1, kind: input, shape index: {}]   ;;  %s1659_s2 = inlined_call_operand.vmem [shape: f32[608,64], index: 2, kind: input, shape index: {}]   ;;  %s1660_s3 = inlined_call_operand.vmem [shape: f32[320,128], index: 3, kind: input, shape index: {}]   ;;  %s1661_s4 = inlined_call_operand.vmem [shape: f32[8,128], index: 4, kind: input, shape index: {}]   ;;  %s1662_s5 = inlined_call_operand.vmem [shape: f32[2,1,128], index: 5, kind: output, shape index: {}]  }
   0x1 LB: > { %s1003_s19 = sadd.s32 4294967295, %s1082_s18   ;;  %p1007_p0 = scmp.ge.s32.totalorder %s1082_s18, 1  ;;  %s1082_s18 = sphi %s1114_s18, %s15_s18  }
   0x2   : > { %p187_p1 = scmp.lt.s32.totalorder %s1082_s18, 3 }
   0x4   : > { %p188_p2 = pnand %p1007_p0, %p187_p1 }
   0x5   : > { %p213_p3 = scmp.lt.s32.totalorder (!%p188_p2), %s1003_s19, 1 }
   0x6   : > { %191 = sbr.rel (%p188_p2) target bundleno = 1033 (0x409), region = 40 }
   0xb   : > { %v261_v0 = vld [vmem:[%s1659_s2 + $0x18] sm:$0xff]  ;;  %v260_v1 = vld [vmem:[%s1659_s2 + $0x10] sm:$0xff]  ;;  %v259_v2 = vld [vmem:[%s1659_s2 + $0x8] sm:$0xff]  ;;  %s1664_s19 = smov (!%p213_p3, %s1003_s19), 1  ;;  %vm263_vm0 = vcmask 261120   ;;  %vm573_vm1 = vcmask 523264  }
   0xc   : > { %372 = vmatpush.msra.mxu0 %v261_v0  ;;  %1055 = vmatpush.msra.mxu2 %v261_v0  ;;  %v258_v3 = vld [vmem:[%s1659_s2] sm:$0xff]  ;;  %s1054_s28 = sshll.u32 %s1664_s19, 8  ;;  %s220_s23 = scalar_lea.vmem %s1662_s5, %s1664_s19 }
   0xd   : > { %1056 = vmatpush.msra.mxu3 %v261_v0  ;;  %s1140_s6 = scalar_lea.vmem %s1657_s0, %s1054_s28  ;;  %v1223_v52 = vld [vmem:[%s1661_s4] ss:$0 sm:$0xff] }
   0xe   : > { %373 = vmatpush.msra.mxu0 %v260_v1  ;;  %1057 = vmatpush.msra.mxu2 %v260_v1  ;;  %v226_v4 = vld [vmem:[%s1140_s6] sm:$0xff]  ;;  %v243_v5 = vld [vmem:[%s1140_s6 + $0x88] sm:$0xff]  ;;  %v252_v6 = vld [vmem:[%s1140_s6 + $0xd0] sm:$0xff] }
   0xf   : > { %1058 = vmatpush.msra.mxu3 %v260_v1  ;;  %v227_v7 = vld [vmem:[%s1140_s6 + $0x8] sm:$0xff]  ;;  %v244_v8 = vld [vmem:[%s1140_s6 + $0x90] sm:$0xff]  ;;  %v253_v9 = vld [vmem:[%s1140_s6 + $0xd8] sm:$0xff] }
  0x10   : > { %374 = vmatpush.msra.mxu0 %v259_v2  ;;  %1059 = vmatpush.msra.mxu2 %v259_v2  ;;  %v228_v10 = vld [vmem:[%s1140_s6 + $0x10] sm:$0xff]  ;;  %v245_v11 = vld [vmem:[%s1140_s6 + $0x98] sm:$0xff]  ;;  %v254_v12 = vld [vmem:[%s1140_s6 + $0xe0] sm:$0xff] }
  0x11   : > { %1060 = vmatpush.msra.mxu3 %v259_v2  ;;  %v229_v13 = vld [vmem:[%s1140_s6 + $0x18] sm:$0xff]  ;;  %v246_v14 = vld [vmem:[%s1140_s6 + $0xa0] sm:$0xff]  ;;  %v255_v15 = vld [vmem:[%s1140_s6 + $0xe8] sm:$0xff] }
  0x12   : > { %375 = vmatpush.msra.mxu0 %v258_v3  ;;  %1061 = vmatpush.msra.mxu2 %v258_v3  ;;  %v230_v16 = vld [vmem:[%s1140_s6 + $0x20] sm:$0xff]  ;;  %v247_v17 = vld [vmem:[%s1140_s6 + $0xa8] sm:$0xff]  ;;  %v256_v18 = vld [vmem:[%s1140_s6 + $0xf0] sm:$0xff] }
  0x13   : > { %1062 = vmatpush.msra.mxu3 %v258_v3  ;;  %1010 = vmatmul.msk.f32.vlgmr.msra.gmra.mxu0 %vm263_vm0, %v226_v4  ;;  %v231_v19 = vld [vmem:[%s1140_s6 + $0x28] sm:$0xff]  ;;  %v248_v20 = vld [vmem:[%s1140_s6 + $0xb0] sm:$0xff]  ;;  %v257_v21 = vld [vmem:[%s1140_s6 + $0xf8] sm:$0xff] }
  0x14   : > { %1027 = vmatmul.msk.f32.vlgmr.msra.gmra.mxu2 %vm263_vm0, %v243_v5  ;;  %1036 = vmatmul.msk.f32.vlgmr.msra.gmra.mxu3 %vm263_vm0, %v252_v6  ;;  %v232_v22 = vld [vmem:[%s1140_s6 + $0x30] sm:$0xff]  ;;  %v249_v23 = vld [vmem:[%s1140_s6 + $0xb8] sm:$0xff]  ;;  %v250_v25 = vld [vmem:[%s1140_s6 + $0xc0] sm:$0xff] }
  0x15   : > { %v233_v24 = vld [vmem:[%s1140_s6 + $0x38] sm:$0xff]  ;;  %v234_v26 = vld [vmem:[%s1140_s6 + $0x40] sm:$0xff]  ;;  %v251_v27 = vld [vmem:[%s1140_s6 + $0xc8] sm:$0xff] }
  0x16   : > { %v235_v28 = vld [vmem:[%s1140_s6 + $0x48] sm:$0xff]  ;;  %v236_v29 = vld [vmem:[%s1140_s6 + $0x50] sm:$0xff]  ;;  %v237_v30 = vld [vmem:[%s1140_s6 + $0x58] sm:$0xff] }
  0x17   : > { %v238_v31 = vld [vmem:[%s1140_s6 + $0x60] sm:$0xff]  ;;  %v239_v32 = vld [vmem:[%s1140_s6 + $0x68] sm:$0xff]  ;;  %v240_v33 = vld [vmem:[%s1140_s6 + $0x70] sm:$0xff] }
  0x18   : > { %v241_v34 = vld [vmem:[%s1140_s6 + $0x78] sm:$0xff]  ;;  %v242_v36 = vld [vmem:[%s1140_s6 + $0x80] sm:$0xff] }
  0x1b   : > { %1011 = vmatmul.msk.f32.gmra.mxu0 %vm263_vm0, %v227_v7 }
  0x1c   : > { %1028 = vmatmul.msk.f32.gmra.mxu2 %vm263_vm0, %v244_v8  ;;  %1037 = vmatmul.msk.f32.gmra.mxu3 %vm263_vm0, %v253_v9 }
  0x23   : > { %1012 = vmatmul.msk.f32.gmra.mxu0 %vm263_vm0, %v228_v10 }
  0x24   : > { %1029 = vmatmul.msk.f32.gmra.mxu2 %vm263_vm0, %v245_v11  ;;  %1038 = vmatmul.msk.f32.gmra.mxu3 %vm263_vm0, %v254_v12 }
  0x2b   : > { %1013 = vmatmul.msk.f32.gmra.mxu0 %vm263_vm0, %v229_v13 }
  0x2c   : > { %1030 = vmatmul.msk.f32.gmra.mxu2 %vm263_vm0, %v246_v14  ;;  %1039 = vmatmul.msk.f32.gmra.mxu3 %vm263_vm0, %v255_v15 }
  0x33   : > { %1014 = vmatmul.msk.f32.gmra.mxu0 %vm263_vm0, %v230_v16 }
  0x34   : > { %1031 = vmatmul.msk.f32.gmra.mxu2 %vm263_vm0, %v247_v17  ;;  %1040 = vmatmul.msk.f32.gmra.mxu3 %vm263_vm0, %v256_v18 }
  0x3b   : > { %1015 = vmatmul.msk.f32.gmra.mxu0 %vm263_vm0, %v231_v19 }
  0x3c   : > { %1032 = vmatmul.msk.f32.gmra.mxu2 %vm263_vm0, %v248_v20  ;;  %1041 = vmatmul.msk.f32.gmra.mxu3 %vm263_vm0, %v257_v21 }
  0x43   : > { %1016 = vmatmul.msk.f32.gmra.mxu0 %vm263_vm0, %v232_v22 }
  0x44   : > { %1033 = vmatmul.msk.f32.gmra.mxu2 %vm263_vm0, %v249_v23 }
  0x4b   : > { %1017 = vmatmul.msk.f32.gmra.mxu0 %vm263_vm0, %v233_v24 }
  0x4c   : > { %1034 = vmatmul.msk.f32.gmra.mxu2 %vm263_vm0, %v250_v25 }
  0x53   : > { %1018 = vmatmul.msk.f32.gmra.mxu0 %vm263_vm0, %v234_v26 }
  0x54   : > { %1035 = vmatmul.msk.f32.gmra.mxu2 %vm263_vm0, %v251_v27 }
  0x5b   : > { %1019 = vmatmul.msk.f32.gmra.mxu0 %vm263_vm0, %v235_v28 }
  0x63   : > { %1020 = vmatmul.msk.f32.gmra.mxu0 %vm263_vm0, %v236_v29 }
  0x6b   : > { %1021 = vmatmul.msk.f32.gmra.mxu0 %vm263_vm0, %v237_v30 }
  0x73   : > { %1022 = vmatmul.msk.f32.gmra.mxu0 %vm263_vm0, %v238_v31 }
  0x7b   : > { %1023 = vmatmul.msk.f32.gmra.mxu0 %vm263_vm0, %v239_v32 }
  0x83   : > { %1024 = vmatmul.msk.f32.gmra.mxu0 %vm263_vm0, %v240_v33 }
  0x8b   : > { %1025 = vmatmul.msk.f32.gmra.mxu0 %vm263_vm0, %v241_v34 }
  0x90   : > { %v1204_v35 = vpop.f32.mrf.mxu0 }
  0x93   : > { %1026 = vmatmul.msk.f32.gmra.mxu0 %vm263_vm0, %v242_v36 }
  0x97   : > { %v1208_v37 = vpop.f32.mrf.mxu2  ;;  %v455_v38 = vpop.f32.mrf.mxu3 }
  0x98   : > { %v1210_v39 = vpop.f32.mrf.mxu0  ;;  %v456_v0 = vadd.f32 %v1223_v52, %v455_v38  ;;  %v429_v25 = vadd.f32 %v1223_v52, %v1208_v37 }
  0x9a   : > { %v499_v5 = vmax.f32 %v456_v0, 0.0  ;;  %v490_v29 = vmax.f32 %v429_v25, 0.0  ;;  %v568_v0 = vld [vmem:[%s1659_s2 + $0x88] sm:$0xff] }
  0x9b   : > { %v609_v25 = vld [vmem:[%s1659_s2 + $0x108] sm:$0xff] }
  0x9f   : > { %v431_v40 = vpop.f32.mrf.mxu2  ;;  %v458_v41 = vpop.f32.mrf.mxu3 }
  0xa0   : > { %v1212_v42 = vpop.f32.mrf.mxu0  ;;  %v459_v62 = vadd.f32 %v1223_v52, %v458_v41  ;;  %v432_v24 = vadd.f32 %v1223_v52, %v431_v40 }
  0xa2   : > { %v500_v3 = vmax.f32 %v459_v62, 0.0  ;;  %v491_v27 = vmax.f32 %v432_v24, 0.0 }
  0xa7   : > { %v434_v43 = vpop.f32.mrf.mxu2  ;;  %v461_v44 = vpop.f32.mrf.mxu3 }
  0xa8   : > { %v1214_v45 = vpop.f32.mrf.mxu0  ;;  %v462_v59 = vadd.f32 %v1223_v52, %v461_v44  ;;  %v435_v22 = vadd.f32 %v1223_v52, %v434_v43 }
  0xaa   : > { %v501_v1 = vmax.f32 %v462_v59, 0.0  ;;  %v492_v26 = vmax.f32 %v435_v22, 0.0  ;;  %v610_v22 = vld [vmem:[%s1659_s2 + $0x110] sm:$0xff] }
  0xaf   : > { %v437_v46 = vpop.f32.mrf.mxu2  ;;  %v464_v47 = vpop.f32.mrf.mxu3 }
  0xb0   : > { %v1216_v48 = vpop.f32.mrf.mxu0  ;;  %v465_v56 = vadd.f32 %v1223_v52, %v464_v47  ;;  %v438_v18 = vadd.f32 %v1223_v52, %v437_v46 }
  0xb2   : > { %v502_v63 = vmax.f32 %v465_v56, 0.0  ;;  %v493_v23 = vmax.f32 %v438_v18, 0.0  ;;  %v506_v56 = vld [vmem:[%s1658_s1 + $0x8] sm:$0xff] }
  0xb7   : > { %v440_v49 = vpop.f32.mrf.mxu2  ;;  %v467_v50 = vpop.f32.mrf.mxu3 }
  0xb8   : > { %v1218_v51 = vpop.f32.mrf.mxu0  ;;  %v468_v53 = vadd.f32 %v1223_v52, %v467_v50  ;;  %v441_v16 = vadd.f32 %v1223_v52, %v440_v49 }
  0xba   : > { %v503_v60 = vmax.f32 %v468_v53, 0.0  ;;  %v494_v20 = vmax.f32 %v441_v16, 0.0  ;;  %v684_v16 = vld [vmem:[%s1659_s2 + $0x1f0] sm:$0xff] }
  0xbf   : > { %v443_v54 = vpop.f32.mrf.mxu2  ;;  %v470_v55 = vpop.f32.mrf.mxu3 }
  0xc0   : > { %v471_v57 = vadd.f32 %v1223_v52, %v470_v55  ;;  %v1228_v58 = vpop.f32.mrf.mxu0  ;;  %v444_v13 = vadd.f32 %v1223_v52, %v443_v54 }
  0xc2   : > { %v504_v61 = vmax.f32 %v471_v57, 0.0  ;;  %v495_v19 = vmax.f32 %v444_v13, 0.0  ;;  %v570_v57 = vld [vmem:[%s1659_s2 + $0x98] sm:$0xff] }
  0xc3   : > { %584 = vmatpush.msrb.mxu3 %v570_v57  ;;  %v685_v13 = vld [vmem:[%s1659_s2 + $0x1f8] sm:$0xff]  ;;  %v604_v57 = vld [vmem:[%s1659_s2 + $0xe0] sm:$0xff] }
  0xc4   : > { %532 = vmatpush.msrb.mxu2 %v504_v61  ;;  %v569_v61 = vld [vmem:[%s1659_s2 + $0x90] sm:$0xff] }
  0xc5   : > { %585 = vmatpush.msrb.mxu3 %v569_v61  ;;  %v599_v61 = vld [vmem:[%s1659_s2 + $0xb8] sm:$0xff] }
  0xc6   : > { %533 = vmatpush.msrb.mxu2 %v503_v60 }
  0xc7   : > { %v446_v2 = vpop.f32.mrf.mxu2  ;;  %586 = vmatpush.msrb.mxu3 %v568_v0  ;;  %v596_v0 = vld [vmem:[%s1659_s2 + $0xa0] sm:$0xff] }
  0xc8   : > { %534 = vmatpush.msrb.mxu2 %v502_v63  ;;  %v1233_v4 = vpop.f32.mrf.mxu0  ;;  %v447_v10 = vadd.f32 %v1223_v52, %v446_v2  ;;  %v688_v2 = vld [vmem:[%s1659_s2 + $0x210] sm:$0xff] }
  0xc9   : > { %v399_v62 = vadd.f32 %v1223_v52, %v1233_v4 }
  0xca   : > { %535 = vmatpush.msrb.mxu2 %v501_v1  ;;  %v496_v17 = vmax.f32 %v447_v10, 0.0  ;;  %v689_v1 = vld [vmem:[%s1659_s2 + $0x218] sm:$0xff]  ;;  %v686_v10 = vld [vmem:[%s1659_s2 + $0x200] sm:$0xff] }
  0xcc   : > { %536 = vmatpush.msrb.mxu2 %v500_v3  ;;  %v396_v3 = vadd.f32 %v1223_v52, %v1228_v58  ;;  %v508_v58 = vld [vmem:[%s1658_s1 + $0x18] sm:$0x1] }
  0xce   : > { %537 = vmatpush.msrb.mxu2 %v499_v5  ;;  %v567_v5 = vld [vmem:[%s1659_s2 + $0x80] sm:$0xff] }
  0xcf   : > { %v449_v6 = vpop.f32.mrf.mxu2  ;;  %587 = vmatpush.msrb.mxu3 %v567_v5 }
  0xd0   : > { %v401_v7 = vpop.f32.mrf.mxu0  ;;  %v450_v8 = vadd.f32 %v1223_v52, %v449_v6  ;;  %v687_v6 = vld [vmem:[%s1659_s2 + $0x208] sm:$0xff] }
  0xd1   : > { %v402_v59 = vadd.f32 %v1223_v52, %v401_v7  ;;  %v393_v7 = vadd.f32 %v1223_v52, %v1218_v51  ;;  %v479_v51 = vmax.f32 %v396_v3, 0.0 }
  0xd2   : > { %v497_v14 = vmax.f32 %v450_v8, 0.0  ;;  %v480_v8 = vmax.f32 %v399_v62, 0.0  ;;  %v598_v62 = vld [vmem:[%s1659_s2 + $0xb0] sm:$0xff] }
  0xd3   : > { %v481_v4 = vmax.f32 %v402_v59, 0.0  ;;  %v600_v59 = vld [vmem:[%s1659_s2 + $0xc0] sm:$0xff] }
  0xd7   : > { %v452_v9 = vpop.f32.mrf.mxu2 }
  0xd8   : > { %v453_v11 = vadd.f32 %v1223_v52, %v452_v9  ;;  %v404_v12 = vpop.f32.mrf.mxu0  ;;  %v566_v9 = vld [vmem:[%s1659_s2 + $0x78] sm:$0xff] }
  0xd9   : > { %v405_v53 = vadd.f32 %v1223_v52, %v404_v12  ;;  %v565_v12 = vld [vmem:[%s1659_s2 + $0x70] sm:$0xff]  ;;  %588 = vmatpush.msrb.mxu3 %v566_v9 }
  0xda   : > { %v498_v15 = vmax.f32 %v453_v11, 0.0  ;;  %v390_v11 = vadd.f32 %v1223_v52, %v1216_v48  ;;  %v564_v48 = vld [vmem:[%s1659_s2 + $0x68] sm:$0xff]  ;;  %v680_v9 = vld [vmem:[%s1659_s2 + $0x1d0] sm:$0xff] }
  0xdb   : > { %v482_v63 = vmax.f32 %v405_v53, 0.0  ;;  %589 = vmatpush.msrb.mxu3 %v565_v12  ;;  %v557_v53 = vld [vmem:[%s1659_s2 + $0x30] sm:$0xff]  ;;  %v678_v12 = vld [vmem:[%s1659_s2 + $0x1c0] sm:$0xff] }
  0xdc   : > { %538 = vmatpush.msrb.mxu2 %v498_v15  ;;  %v478_v15 = vmax.f32 %v393_v7, 0.0  ;;  %v477_v18 = vmax.f32 %v390_v11, 0.0  ;;  %v720_v7 = vld [vmem:[%s1659_s2 + $0x258] sm:$0xff]  ;;  %v679_v11 = vld [vmem:[%s1659_s2 + $0x1c8] sm:$0xff] }
  0xdd   : > { %590 = vmatpush.msrb.mxu3 %v564_v48 }
  0xde   : > { %539 = vmatpush.msrb.mxu2 %v497_v14  ;;  %v387_v14 = vadd.f32 %v1223_v52, %v1214_v45  ;;  %v563_v45 = vld [vmem:[%s1659_s2 + $0x60] sm:$0xff] }
  0xdf   : > { %591 = vmatpush.msrb.mxu3 %v563_v45 }
  0xe0   : > { %540 = vmatpush.msrb.mxu2 %v496_v17  ;;  %v407_v21 = vpop.f32.mrf.mxu0  ;;  %v384_v17 = vadd.f32 %v1223_v52, %v1212_v42  ;;  %v683_v42 = vld [vmem:[%s1659_s2 + $0x1e8] sm:$0xff] }
  0xe1   : > { %v408_v47 = vadd.f32 %v1223_v52, %v407_v21  ;;  %v476_v21 = vmax.f32 %v387_v14, 0.0  ;;  %v716_v14 = vld [vmem:[%s1659_s2 + $0x238] sm:$0xff] }
  0xe2   : > { %541 = vmatpush.msrb.mxu2 %v495_v19  ;;  %v611_v19 = vld [vmem:[%s1659_s2 + $0x118] sm:$0xff]  ;;  %v475_v24 = vmax.f32 %v384_v17, 0.0  ;;  %v676_v17 = vld [vmem:[%s1659_s2 + $0x1b0] sm:$0xff] }
  0xe3   : > { %v483_v60 = vmax.f32 %v408_v47, 0.0  ;;  %623 = vmatpush.msra.mxu3 %v611_v19  ;;  %v558_v47 = vld [vmem:[%s1659_s2 + $0x38] sm:$0xff] }
  0xe4   : > { %542 = vmatpush.msrb.mxu2 %v494_v20  ;;  %v381_v20 = vadd.f32 %v1223_v52, %v1210_v39  ;;  %v682_v39 = vld [vmem:[%s1659_s2 + $0x1e0] sm:$0xff] }
  0xe5   : > { %624 = vmatpush.msra.mxu3 %v610_v22  ;;  %v674_v22 = vld [vmem:[%s1659_s2 + $0x1a0] sm:$0xff] }
  0xe6   : > { %543 = vmatpush.msrb.mxu2 %v493_v23  ;;  %v378_v23 = vadd.f32 %v1223_v52, %v1204_v35  ;;  %v608_v35 = vld [vmem:[%s1659_s2 + $0x100] sm:$0xff] }
  0xe7   : > { %625 = vmatpush.msra.mxu3 %v609_v25  ;;  %v640_v25 = vld [vmem:[%s1659_s2 + $0x148] sm:$0xff] }
  0xe8   : > { %544 = vmatpush.msrb.mxu2 %v492_v26  ;;  %v410_v28 = vpop.f32.mrf.mxu0  ;;  %v474_v26 = vmax.f32 %v381_v20, 0.0  ;;  %v675_v20 = vld [vmem:[%s1659_s2 + $0x1a8] sm:$0xff] }
  0xe9   : > { %v411_v43 = vadd.f32 %v1223_v52, %v410_v28  ;;  %v505_v28 = vld [vmem:[%s1658_s1] sm:$0xff]  ;;  %626 = vmatpush.msra.mxu3 %v608_v35  ;;  %v637_v35 = vld [vmem:[%s1659_s2 + $0x130] sm:$0xff] }
  0xea   : > { %545 = vmatpush.msrb.mxu2 %v491_v27  ;;  %v603_v27 = vld [vmem:[%s1659_s2 + $0xd8] sm:$0xff] }
  0xeb   : > { %v484_v54 = vmax.f32 %v411_v43, 0.0  ;;  %v561_v43 = vld [vmem:[%s1659_s2 + $0x50] sm:$0xff] }
  0xec   : > { %546 = vmatpush.msrb.mxu2 %v490_v29  ;;  %v650_v29 = vld [vmem:[%s1659_s2 + $0x198] sm:$0xff] }
  0xf0   : > { %v413_v30 = vpop.f32.mrf.mxu0 }
  0xf1   : > { %v414_v37 = vadd.f32 %v1223_v52, %v413_v30  ;;  %v607_v30 = vld [vmem:[%s1659_s2 + $0xf8] sm:$0xff] }
  0xf2   : > { %627 = vmatpush.msra.mxu3 %v607_v30  ;;  %v847_v30 = vld [vmem:[%s1660_s3 + $0x38] sm:$0xff] }
  0xf3   : > { %v485_v49 = vmax.f32 %v414_v37, 0.0  ;;  %v643_v37 = vld [vmem:[%s1659_s2 + $0x160] sm:$0xff] }
  0xf8   : > { %v416_v31 = vpop.f32.mrf.mxu0 }
  0xf9   : > { %v417_v38 = vadd.f32 %v1223_v52, %v416_v31  ;;  %v649_v31 = vld [vmem:[%s1659_s2 + $0x190] sm:$0xff] }
  0xfb   : > { %v486_v44 = vmax.f32 %v417_v38, 0.0  ;;  %v645_v38 = vld [vmem:[%s1659_s2 + $0x170] sm:$0xff] }
 0x100   : > { %v419_v32 = vpop.f32.mrf.mxu0 }
 0x101   : > { %v420_v34 = vadd.f32 %v1223_v52, %v419_v32  ;;  %v648_v32 = vld [vmem:[%s1659_s2 + $0x188] sm:$0xff] }
 0x103   : > { %v487_v41 = vmax.f32 %v420_v34, 0.0  ;;  %v507_v34 = vld [vmem:[%s1658_s1 + $0x10] sm:$0x1] }
 0x108   : > { %v422_v33 = vpop.f32.mrf.mxu0 }
 0x109   : > { %v423_v36 = vadd.f32 %v1223_v52, %v422_v33  ;;  %v647_v33 = vld [vmem:[%s1659_s2 + $0x180] sm:$0xff] }
 0x10b   : > { %v488_v40 = vmax.f32 %v423_v36, 0.0  ;;  %v646_v36 = vld [vmem:[%s1659_s2 + $0x178] sm:$0xff] }
 0x10d   : > { %509 = vmatpush.msra.mxu1 %v488_v40  ;;  %v644_v40 = vld [vmem:[%s1659_s2 + $0x168] sm:$0xff] }
 0x10f   : > { %510 = vmatpush.msra.mxu1 %v487_v41  ;;  %v562_v41 = vld [vmem:[%s1659_s2 + $0x58] sm:$0xff] }
 0x110   : > { %v425_v46 = vpop.f32.mrf.mxu0 }
 0x111   : > { %511 = vmatpush.msra.mxu1 %v486_v44  ;;  %v426_v50 = vadd.f32 %v1223_v52, %v425_v46  ;;  %v473_v52 = vmax.f32 %v378_v23, 0.0  ;;  %v560_v44 = vld [vmem:[%s1659_s2 + $0x48] sm:$0xff]  ;;  %v559_v46 = vld [vmem:[%s1659_s2 + $0x40] sm:$0xff] }
 0x113   : > { %512 = vmatpush.msra.mxu1 %v485_v49  ;;  %v489_v55 = vmax.f32 %v426_v50, 0.0  ;;  %v606_v49 = vld [vmem:[%s1659_s2 + $0xf0] sm:$0xff] }
 0x114   : > { %v602_v50 = vld [vmem:[%s1659_s2 + $0xd0] sm:$0xff]  ;;  %628 = vmatpush.msra.mxu3 %v606_v49  ;;  %v884_v49 = vld [vmem:[%s1660_s3 + $0xa0] sm:$0xff] }
 0x115   : > { %513 = vmatpush.msra.mxu1 %v484_v54  ;;  %547 = vmatpush.msrb.mxu2 %v489_v55  ;;  %v605_v54 = vld [vmem:[%s1659_s2 + $0xe8] sm:$0xff] }
 0x116   : > { %548 = vmatmul.f32.vlgmr.msrb.gmra.mxu2 %v506_v56  ;;  %v601_v55 = vld [vmem:[%s1659_s2 + $0xc8] sm:$0xff]  ;;  %629 = vmatpush.msra.mxu3 %v605_v54  ;;  %v882_v54 = vld [vmem:[%s1660_s3 + $0x90] sm:$0xff] }
 0x117   : > { %514 = vmatpush.msra.mxu1 %v483_v60  ;;  %701 = vmatpush.msra.mxu2 %v689_v1  ;;  %v556_v56 = vld [vmem:[%s1659_s2 + $0x28] sm:$0xff]  ;;  %v555_v60 = vld [vmem:[%s1659_s2 + $0x20] sm:$0xff] }
 0x118   : > { %630 = vmatpush.msra.mxu3 %v604_v57 }
 0x119   : > { %515 = vmatpush.msra.mxu1 %v482_v63  ;;  %702 = vmatpush.msra.mxu2 %v688_v2  ;;  %v597_v63 = vld [vmem:[%s1659_s2 + $0xa8] sm:$0xff] }
 0x11b   : > { %516 = vmatpush.msra.mxu1 %v481_v4  ;;  %703 = vmatpush.msra.mxu2 %v687_v6 }
 0x11d   : > { %517 = vmatpush.msra.mxu1 %v480_v8  ;;  %704 = vmatpush.msra.mxu2 %v686_v10  ;;  %v681_v8 = vld [vmem:[%s1659_s2 + $0x1d8] sm:$0xff]  ;;  %v718_v10 = vld [vmem:[%s1659_s2 + $0x248] sm:$0xff] }
 0x11e   : > { %551 = vmatmul.f32.gmra.mxu2 %v508_v58  ;;  %v719_v58 = vld [vmem:[%s1659_s2 + $0x250] sm:$0xff] }
 0x11f   : > { %518 = vmatpush.msra.mxu1 %v479_v51  ;;  %705 = vmatpush.msra.mxu2 %v685_v13  ;;  %v717_v51 = vld [vmem:[%s1659_s2 + $0x240] sm:$0xff] }
 0x121   : > { %519 = vmatpush.msra.mxu1 %v478_v15  ;;  %706 = vmatpush.msra.mxu2 %v684_v16  ;;  %v677_v15 = vld [vmem:[%s1659_s2 + $0x1b8] sm:$0xff]  ;;  %v715_v16 = vld [vmem:[%s1659_s2 + $0x230] sm:$0xff] }
 0x123   : > { %520 = vmatpush.msra.mxu1 %v477_v18  ;;  %707 = vmatpush.msra.mxu2 %v683_v42  ;;  %v714_v18 = vld [vmem:[%s1659_s2 + $0x228] sm:$0xff]  ;;  %v642_v42 = vld [vmem:[%s1659_s2 + $0x158] sm:$0xff] }
 0x125   : > { %521 = vmatpush.msra.mxu1 %v476_v21  ;;  %708 = vmatpush.msra.mxu2 %v682_v39  ;;  %v713_v21 = vld [vmem:[%s1659_s2 + $0x220] sm:$0xff]  ;;  %v641_v39 = vld [vmem:[%s1659_s2 + $0x150] sm:$0xff] }
 0x127   : > { %522 = vmatpush.msra.mxu1 %v475_v24  ;;  %777 = vmatpush.msrb.mxu2 %v603_v27  ;;  %v638_v27 = vld [vmem:[%s1659_s2 + $0x138] sm:$0xff] }
 0x129   : > { %523 = vmatpush.msra.mxu1 %v474_v26  ;;  %778 = vmatpush.msrb.mxu2 %v602_v50  ;;  %v639_v26 = vld [vmem:[%s1659_s2 + $0x140] sm:$0xff]  ;;  %v883_v50 = vld [vmem:[%s1660_s3 + $0x98] sm:$0xff] }
 0x12b   : > { %524 = vmatpush.msra.mxu1 %v473_v52  ;;  %779 = vmatpush.msrb.mxu2 %v601_v55  ;;  %v636_v52 = vld [vmem:[%s1659_s2 + $0x128] sm:$0xff] }
 0x12c   : > { %525 = vmatmul.f32.vlgmr.msra.gmra.mxu1 %v505_v28  ;;  %v635_v28 = vld [vmem:[%s1659_s2 + $0x120] sm:$0xff] }
 0x12d   : > { %662 = vmatpush.msrb.mxu1 %v650_v29  ;;  %780 = vmatpush.msrb.mxu2 %v600_v59  ;;  %v880_v59 = vld [vmem:[%s1660_s3 + $0x80] sm:$0xff] }
 0x12f   : > { %663 = vmatpush.msrb.mxu1 %v649_v31  ;;  %781 = vmatpush.msrb.mxu2 %v599_v61  ;;  %v846_v31 = vld [vmem:[%s1660_s3 + $0x30] sm:$0xff] }
 0x130   : > { %v878_v61 = vld [vmem:[%s1660_s3 + $0x70] sm:$0xff] }
 0x131   : > { %664 = vmatpush.msrb.mxu1 %v648_v32  ;;  %782 = vmatpush.msrb.mxu2 %v598_v62  ;;  %v845_v32 = vld [vmem:[%s1660_s3 + $0x28] sm:$0xff] }
 0x133   : > { %665 = vmatpush.msrb.mxu1 %v647_v33  ;;  %783 = vmatpush.msrb.mxu2 %v597_v63  ;;  %v844_v33 = vld [vmem:[%s1660_s3 + $0x20] sm:$0xff]  ;;  %v877_v63 = vld [vmem:[%s1660_s3 + $0x68] sm:$0xff] }
 0x134   : > { %528 = vmatmul.f32.gmra.mxu1 %v507_v34 }
 0x135   : > { %666 = vmatpush.msrb.mxu1 %v646_v36  ;;  %784 = vmatpush.msrb.mxu2 %v596_v0  ;;  %v843_v36 = vld [vmem:[%s1660_s3 + $0x18] sm:$0xff] }
 0x137   : > { %667 = vmatpush.msrb.mxu1 %v645_v38  ;;  %v842_v38 = vld [vmem:[%s1660_s3 + $0x10] sm:$0xff] }
 0x139   : > { %668 = vmatpush.msrb.mxu1 %v644_v40  ;;  %v841_v40 = vld [vmem:[%s1660_s3 + $0x8] sm:$0xff] }
 0x13b   : > { %669 = vmatpush.msrb.mxu1 %v643_v37  ;;  %v840_v37 = vld [vmem:[%s1660_s3] sm:$0xff] }
 0x13d   : > { %754 = vmatpush.msra.mxu1 %v562_v41 }
 0x13f   : > { %755 = vmatpush.msra.mxu1 %v561_v43  ;;  %v887_v43 = vld [vmem:[%s1660_s3 + $0xb8] sm:$0xff] }
 0x141   : > { %756 = vmatpush.msra.mxu1 %v560_v44  ;;  %v886_v44 = vld [vmem:[%s1660_s3 + $0xb0] sm:$0xff] }
 0x143   : > { %757 = vmatpush.msra.mxu1 %v559_v46  ;;  %v885_v46 = vld [vmem:[%s1660_s3 + $0xa8] sm:$0xff] }
 0x145   : > { %758 = vmatpush.msra.mxu1 %v558_v47 }
 0x147   : > { %759 = vmatpush.msra.mxu1 %v557_v53 }
 0x149   : > { %760 = vmatpush.msra.mxu1 %v556_v56  ;;  %v881_v56 = vld [vmem:[%s1660_s3 + $0x88] sm:$0xff] }
 0x14b   : > { %761 = vmatpush.msra.mxu1 %v555_v60  ;;  %v879_v60 = vld [vmem:[%s1660_s3 + $0x78] sm:$0xff] }
 0x199   : > { %v549_v1 = vpop.f32.mrf.mxu2 }
 0x1a1   : > { %v552_v19 = vpop.f32.mrf.mxu2 }
 0x1a9   : > { %v526_v2 = vpop.f32.mrf.mxu1 }
 0x1aa   : > { %v1426_v3 = vadd.f32 %v549_v1, %v526_v2  ;;  %v876_v2 = vld [vmem:[%s1660_s3 + $0x60] sm:$0xff] }
 0x1ac   : > { %v572_v4 = vrot.slane %v1426_v3, 1  ;;  %v651_v5 = vrot.slane %v1426_v3, 5  ;;  %v690_v6 = vrot.slane %v1426_v3, 7  ;;  %v612_v13 = vrot.slane %v1426_v3, 3 }
 0x1ad   : > { %v766_v48 = vrot.slane %v1426_v3, 2  ;;  %v812_v24 = vrot.slane %v1426_v3, 6  ;;  %v789_v29 = vrot.slane %v1426_v3, 4 }
 0x1ae   : > { %1042 = vmatmul.msk.f32.vlgmr.msrb.gmra.mxu3 %vm573_vm1, %v572_v4  ;;  %1044 = vmatmul.msk.f32.vlgmr.msrb.gmra.mxu1 %vm573_vm1, %v651_v5 }
 0x1af   : > { %1045 = vmatmul.msk.f32.vlgmr.msra.gmra.mxu2 %vm573_vm1, %v690_v6  ;;  %732 = vmatpush.msrb.mxu3 %v720_v7  ;;  %v875_v7 = vld [vmem:[%s1660_s3 + $0x58] sm:$0xff] }
 0x1b0   : > { %823 = vmatpush.msrb.mxu1 %v681_v8  ;;  %859 = vmatpush.msra.mxu2 %v847_v30 }
 0x1b1   : > { %733 = vmatpush.msrb.mxu3 %v719_v58  ;;  %v529_v45 = vpop.f32.mrf.mxu1 }
 0x1b2   : > { %824 = vmatpush.msrb.mxu1 %v680_v9  ;;  %v553_v23 = vadd.f32 %v552_v19, %v529_v45  ;;  %860 = vmatpush.msra.mxu2 %v846_v31  ;;  %v919_v45 = vld [vmem:[%s1660_s3 + $0x110] sm:$0xff]  ;;  %v918_v19 = vld [vmem:[%s1660_s3 + $0x108] sm:$0xff] }
 0x1b3   : > { %734 = vmatpush.msrb.mxu3 %v718_v10  ;;  %v222_v10 = vld [vmem:[%s1661_s4 + $0x1] sm:$0x1] }
 0x1b4   : > { %825 = vmatpush.msrb.mxu1 %v679_v11  ;;  %861 = vmatpush.msra.mxu2 %v845_v32 }
 0x1b5   : > { %735 = vmatpush.msrb.mxu3 %v717_v51 }
 0x1b6   : > { %826 = vmatpush.msrb.mxu1 %v678_v12  ;;  %1043 = vmatmul.msk.f32.vlgmr.msra.gmra.mxu3 %vm573_vm1, %v612_v13  ;;  %v874_v12 = vld [vmem:[%s1660_s3 + $0x50] sm:$0xff]  ;;  %v873_v13 = vld [vmem:[%s1660_s3 + $0x48] sm:$0xff] }
 0x1b7   : > { %736 = vmatpush.msrb.mxu3 %v716_v14  ;;  %1047 = vmatmul.msk.f32.vlgmr.msra.gmra.mxu1 %vm573_vm1, %v1426_v3  ;;  %v872_v14 = vld [vmem:[%s1660_s3 + $0x40] sm:$0xff] }
 0x1b8   : > { %1048 = vmatmul.msk.f32.vlgmr.msrb.gmra.mxu2 %vm573_vm1, %v766_v48  ;;  %827 = vmatpush.msrb.mxu1 %v677_v15  ;;  %v924_v15 = vld [vmem:[%s1660_s3 + $0x138] sm:$0xff]  ;;  %v923_v48 = vld [vmem:[%s1660_s3 + $0x130] sm:$0xff] }
 0x1b9   : > { %737 = vmatpush.msrb.mxu3 %v715_v16  ;;  %862 = vmatpush.msra.mxu2 %v844_v33  ;;  %v922_v16 = vld [vmem:[%s1660_s3 + $0x128] sm:$0xff]  ;;  %v225_v33 = vld [vmem:[%s1661_s4 + $0x4] sm:$0x1] }
 0x1ba   : > { %828 = vmatpush.msrb.mxu1 %v676_v17  ;;  %v921_v17 = vld [vmem:[%s1660_s3 + $0x120] sm:$0xff] }
 0x1bb   : > { %738 = vmatpush.msrb.mxu3 %v714_v18  ;;  %863 = vmatpush.msra.mxu2 %v843_v36  ;;  %v920_v18 = vld [vmem:[%s1660_s3 + $0x118] sm:$0xff] }
 0x1bc   : > { %829 = vmatpush.msrb.mxu1 %v675_v20  ;;  %v917_v20 = vld [vmem:[%s1660_s3 + $0x100] sm:$0xff] }
 0x1bd   : > { %739 = vmatpush.msrb.mxu3 %v713_v21  ;;  %864 = vmatpush.msra.mxu2 %v842_v38  ;;  %v916_v21 = vld [vmem:[%s1660_s3 + $0xf8] sm:$0xff] }
 0x1be   : > { %830 = vmatpush.msrb.mxu1 %v674_v22  ;;  %1046 = vmatmul.msk.f32.vlgmr.msrb.gmra.mxu3 %vm573_vm1, %v553_v23  ;;  %v914_v22 = vld [vmem:[%s1660_s3 + $0xe8] sm:$0xff]  ;;  %v913_v23 = vld [vmem:[%s1660_s3 + $0xe0] sm:$0xff] }
 0x1bf   : > { %800 = vmatpush.msra.mxu3 %v642_v42  ;;  %1050 = vmatmul.msk.f32.vlgmr.msrb.gmra.mxu1 %vm573_vm1, %v812_v24  ;;  %v915_v42 = vld [vmem:[%s1660_s3 + $0xf0] sm:$0xff]  ;;  %v912_v24 = vld [vmem:[%s1660_s3 + $0xd8] sm:$0xff] }
 0x1c0   : > { %865 = vmatpush.msra.mxu2 %v841_v40  ;;  %925 = vmatpush.msra.mxu1 %v924_v15 }
 0x1c1   : > { %801 = vmatpush.msra.mxu3 %v641_v39  ;;  %v223_v39 = vld [vmem:[%s1661_s4 + $0x2] sm:$0x1] }
 0x1c2   : > { %866 = vmatpush.msra.mxu2 %v840_v37  ;;  %926 = vmatpush.msra.mxu1 %v923_v48 }
 0x1c3   : > { %802 = vmatpush.msra.mxu3 %v640_v25 }
 0x1c4   : > { %927 = vmatpush.msra.mxu1 %v922_v16 }
 0x1c5   : > { %803 = vmatpush.msra.mxu3 %v639_v26 }
 0x1c6   : > { %928 = vmatpush.msra.mxu1 %v921_v17 }
 0x1c7   : > { %804 = vmatpush.msra.mxu3 %v638_v27 }
 0x1c8   : > { %929 = vmatpush.msra.mxu1 %v920_v18 }
 0x1c9   : > { %805 = vmatpush.msra.mxu3 %v637_v35  ;;  %v911_v35 = vld [vmem:[%s1660_s3 + $0xd0] sm:$0xff] }
 0x1ca   : > { %930 = vmatpush.msra.mxu1 %v919_v45 }
 0x1cb   : > { %806 = vmatpush.msra.mxu3 %v636_v52  ;;  %v910_v52 = vld [vmem:[%s1660_s3 + $0xc8] sm:$0xff] }
 0x1cc   : > { %931 = vmatpush.msra.mxu1 %v918_v19 }
 0x1cd   : > { %807 = vmatpush.msra.mxu3 %v635_v28  ;;  %v909_v28 = vld [vmem:[%s1660_s3 + $0xc0] sm:$0xff] }
 0x1ce   : > { %1049 = vmatmul.msk.f32.vlgmr.msra.gmra.mxu3 %vm573_vm1, %v789_v29  ;;  %932 = vmatpush.msra.mxu1 %v917_v20  ;;  %v224_v29 = vld [vmem:[%s1661_s4 + $0x3] sm:$0x1] }
 0x1cf   : > { %888 = vmatpush.msrb.mxu3 %v887_v43 }
 0x1d0   : > { %933 = vmatpush.msra.mxu1 %v916_v21 }
 0x1d1   : > { %889 = vmatpush.msrb.mxu3 %v886_v44 }
 0x1d2   : > { %934 = vmatpush.msra.mxu1 %v915_v42 }
 0x1d3   : > { %890 = vmatpush.msrb.mxu3 %v885_v46 }
 0x1d4   : > { %935 = vmatpush.msra.mxu1 %v914_v22 }
 0x1d5   : > { %891 = vmatpush.msrb.mxu3 %v884_v49 }
 0x1d6   : > { %936 = vmatpush.msra.mxu1 %v913_v23 }
 0x1d7   : > { %892 = vmatpush.msrb.mxu3 %v883_v50 }
 0x1d8   : > { %937 = vmatpush.msra.mxu1 %v912_v24 }
 0x1d9   : > { %893 = vmatpush.msrb.mxu3 %v882_v54 }
 0x1da   : > { %938 = vmatpush.msra.mxu1 %v911_v35 }
 0x1db   : > { %894 = vmatpush.msrb.mxu3 %v881_v56 }
 0x1dc   : > { %939 = vmatpush.msra.mxu1 %v910_v52 }
 0x1dd   : > { %895 = vmatpush.msrb.mxu3 %v880_v59 }
 0x1de   : > { %940 = vmatpush.msra.mxu1 %v909_v28 }
 0x1df   : > { %896 = vmatpush.msrb.mxu3 %v879_v60 }
 0x1e1   : > { %897 = vmatpush.msrb.mxu3 %v878_v61 }
 0x1e3   : > { %898 = vmatpush.msrb.mxu3 %v877_v63 }
 0x1e5   : > { %899 = vmatpush.msrb.mxu3 %v876_v2 }
 0x1e7   : > { %900 = vmatpush.msrb.mxu3 %v875_v7 }
 0x1e9   : > { %901 = vmatpush.msrb.mxu3 %v874_v12 }
 0x1eb   : > { %902 = vmatpush.msrb.mxu3 %v873_v13 }
 0x1ed   : > { %903 = vmatpush.msrb.mxu3 %v872_v14 }
 0x22b   : > { %v671_v41 = vpop.f32.mrf.mxu1 }
 0x231   : > { %v593_v34 = vpop.f32.mrf.mxu3 }
 0x232   : > { %v710_v53 = vpop.f32.mrf.mxu2 }
 0x234   : > { %v763_v55 = vpop.f32.mrf.mxu1 }
 0x235   : > { %v764_v4 = vadd.f32 %v763_v55, %v593_v34 }
 0x239   : > { %v632_v47 = vpop.f32.mrf.mxu3 }
 0x23b   : > { %v786_v62 = vpop.f32.mrf.mxu2 }
 0x23c   : > { %v832_v0 = vpop.f32.mrf.mxu1  ;;  %v787_v1 = vadd.f32 %v786_v62, %v632_v47 }
 0x23d   : > { %v833_v5 = vadd.f32 %v832_v0, %v710_v53 }
 0x23e   : > { %v835_v8 = vadd.f32 %v787_v1, %v764_v4 }
 0x241   : > { %v741_v57 = vpop.f32.mrf.mxu3 }
 0x251   : > { %v809_v3 = vpop.f32.mrf.mxu3 }
 0x252   : > { %v810_v6 = vadd.f32 %v809_v3, %v671_v41 }
 0x254   : > { %v836_v58 = vadd.f32 %v833_v5, %v810_v6 }
 0x256   : > { %v837_v9 = vadd.f32 %v836_v58, %v835_v8 }
 0x258   : > { %v838_v11 = vadd.f32 %v837_v9, %v741_v57 }
 0x25a   : > { %v839_v51 = vadd.f32 %v838_v11, %v222_v10 }
 0x25c   : > { %1051 = vmatmul.msk.f32.vlgmr.msra.gmra.mxu2 %vm573_vm1, %v839_v51 }
 0x2df   : > { %v868_v25 = vpop.f32.mrf.mxu2 }
 0x2e0   : > { %v869_v26 = vadd.f32 %v868_v25, %v223_v39 }
 0x2e2   : > { %v871_v27 = vmax.f32 %v869_v26, 0.0 }
 0x2e4   : > { %904 = vmatmul.f32.vlgmr.msrb.gmra.mxu3 %v871_v27 }
 0x367   : > { %v905_v30 = vpop.f32.mrf.mxu3 }
 0x368   : > { %v906_v31 = vadd.f32 %v905_v30, %v224_v29 }
 0x36a   : > { %v908_v32 = vmax.f32 %v906_v31, 0.0 }
 0x36c   : > { %941 = vmatmul.f32.vlgmr.msra.gmra.mxu1 %v908_v32 }
 0x3e9   : > { %v942_v34 = vpop.f32.mrf.mxu1 }
 0x3ea   : > { %v943_v36 = vadd.f32 %v942_v34, %v225_v33 }
 0x3ec   : > { %v946_v38 = vand.u32 2147483647, %v943_v36  ;;  %v945_v46 = vmax.f32 %v943_v36, 0.0 }
 0x3ee   : > { %v947_v40 = vsub.f32 0.0, %v946_v38 }
 0x3f0   : > { %v948_v37 = vmul.f32 1.442695, %v947_v40 }
 0x3f2   : > { %1072 = vpow2.f32 %v948_v37 }
 0x3f8   : > { %v1073_v41 = vpop.eup %1072 }
 0x3f9   : > { %v950_v43 = vadd.f32 1.0, %v1073_v41 }
 0x3fb   : > { %1074 = vlog2.f32 %v950_v43 }
 0x401   : > { %v1075_v44 = vpop.eup %1074 }
 0x402   : > { %v952_v47 = vmul.f32 0.6931472, %v1075_v44 }
 0x404   : > { %v953_v49 = vadd.f32 %v952_v47, %v945_v46 }
 0x406   : > { %v954_v50 = vadd.f32 1e-06, %v953_v49 }
 0x408   : > { %955 = vst [vmem:[%s220_s23] sm:$0x1] %v954_v50 }
 0x409 PF: > { %s15_s18 = sadd.s32 1, %s1082_s18  }
 0x40a   : > { %p12_p4 = scmp.ge.s32.totalorder %s15_s18, 4  }
 0x40c   :  { %14 = sbr.rel (!%p12_p4) target bundleno = 1 (0x1), region = 70 }

</bundles_post_ra>
